<compile_context>
chip_gen: v7x
topology: tpu7x:2x2x1
jax: 0.10.0
libtpu: 0.0.40
codegen_flags: <defaults>
</compile_context>

<pallas_src>
import jax
import jax.numpy as jnp
from jax import lax
from jax.experimental import pallas as pl
from jax.experimental.pallas import tpu as pltpu


def sgns_loss_kernel(meta_ref, ein_ref, eout_ref, part_ref):
    """One batch tile: gather rows, row-wise dot, log-sigmoid, partial sum."""
    tb = meta_ref.shape[0]
    vocab = ein_ref.shape[0]

    meta = meta_ref[...]                                  # (TILE_B, 4) int32
    idx1 = meta[:, 0:1]                                   # (TILE_B, 1)
    idx2 = meta[:, 1:2]                                   # (TILE_B, 1)
    lab = meta[:, 2:3].astype(jnp.float32)                # (TILE_B, 1)

    # Fused gather: one-hot rows x VMEM-resident (bf16) table on the MXU.
    iota_v = lax.broadcasted_iota(jnp.int32, (tb, vocab), 1)
    oh1 = (iota_v == idx1).astype(ein_ref.dtype)
    oh2 = (iota_v == idx2).astype(eout_ref.dtype)
    e1 = jnp.dot(oh1, ein_ref[...], preferred_element_type=jnp.float32)
    e2 = jnp.dot(oh2, eout_ref[...], preferred_element_type=jnp.float32)

    # bmm((B,1,D),(B,D,1)).squeeze(2) == row-wise dot product -> (TILE_B, 1)
    s = jnp.sum(e1 * e2, axis=-1, keepdims=True)

    # Branch-free, numerically stable log(sigmoid(s)).
    pred = jnp.minimum(s, 0.0) - jnp.log1p(jnp.exp(-jnp.abs(s)))

    # Partial sum of -label * pred; padded rows carry label == 0 -> exactly 0.
    partial = jnp.sum(-lab * pred)

    # Lane-dense unmasked (8,128) store of this tile's partial sum.
    part_ref[...] = jnp.full((8, 128), partial, dtype=jnp.float32)


def sgns_forward(embed_in, embed_out, word1, word2, label, *, tile_b=512,
                 table_dtype=jnp.bfloat16):
    """loss.mean() of the SGNS forward, fully fused into one Pallas kernel."""
    B = word1.shape[0]
    V, D = embed_in.shape

    # --- vocab padding: K dim of the one-hot matmul aligned to 128 lanes ----
    vp = int(pl.cdiv(V, 128)) * 128
    ein = jnp.pad(embed_in.astype(table_dtype), ((0, vp - V), (0, 0)))
    eout = jnp.pad(embed_out.astype(table_dtype), ((0, vp - V), (0, 0)))

    # --- batch tiling / padding --------------------------------------------
    # Clamp the tile to the (8-aligned) batch so tiny demos don't over-pad,
    # while large batches use the full 512-row MXU-friendly tile.
    tile_b = max(8, min(tile_b, int(pl.cdiv(B, 8)) * 8))
    bp = int(pl.cdiv(B, tile_b)) * tile_b
    pad = bp - B
    num_tiles = bp // tile_b

    # Padded rows get word index 0 (a valid row) and label 0 so they
    # contribute exactly 0; the wrapper divides by the true B.
    w1 = jnp.pad(word1.astype(jnp.int32), (0, pad))
    w2 = jnp.pad(word2.astype(jnp.int32), (0, pad))
    lb = jnp.pad(label.astype(jnp.int32), (0, pad))
    meta = jnp.stack([w1, w2, lb, jnp.zeros_like(w1)], axis=1)   # (bp, 4)

    # --- explicit VMEM budget (v7x: 64 MiB physical, 32 MiB default scoped) --
    tbl_itm = jnp.dtype(table_dtype).itemsize
    table_bytes = 2 * vp * D * tbl_itm            # single-buffered tables
    onehot_bytes = 2 * tile_b * vp * tbl_itm      # oh1 / oh2 intermediates
    act_bytes = 2 * tile_b * D * 4                # e1 / e2 in f32
    meta_bytes = 2 * tile_b * 4 * 4               # double-buffered meta tile
    out_bytes = 2 * 8 * 128 * 4                   # double-buffered partials
    budget = 2 * (table_bytes + onehot_bytes + act_bytes + meta_bytes
                  + out_bytes) + (4 << 20)
    vmem_limit = min(max(budget, 32 << 20), 56 << 20)   # stay under v7x 64 MiB

    # TODO(synk): for realistic vocab sizes (V >~ 10k) replace the one-hot MXU
    # gather with scalar-prefetched indices + manual double-buffered
    # make_async_copy row gathers from tables left in HBM (memory_space=pl.ANY)
    # so the tables need not be VMEM resident and gather cost is O(tile_b*D).
    partials = pl.pallas_call(
        sgns_loss_kernel,
        out_shape=jax.ShapeDtypeStruct((num_tiles * 8, 128), jnp.float32),
        grid=(num_tiles,),
        in_specs=[
            # packed (word1, word2, label, pad) -> one DMA per grid step
            pl.BlockSpec((tile_b, 4), lambda t: (t, 0)),
            # resident tables: constant index_map, single-buffered
            pl.BlockSpec((vp, D), lambda t: (0, 0),
                         pipeline_mode=pl.Buffered(1)),
            pl.BlockSpec((vp, D), lambda t: (0, 0),
                         pipeline_mode=pl.Buffered(1)),
        ],
        out_specs=pl.BlockSpec((8, 128), lambda t: (t, 0)),
        compiler_params=pltpu.CompilerParams(
            dimension_semantics=("parallel",),   # independent per-tile partials
            vmem_limit_bytes=int(vmem_limit)),
    )(meta, ein, eout)

    # One representative element per (8,128) partial block, then mean over the
    # *global* batch (padding excluded via label=0 rows).
    per_tile = partials[0::8, 0]                  # (num_tiles,)
    return jnp.sum(per_tile) / B


if __name__ == "__main__":
    # Small synthetic setup consistent with the module's forward.
    vocab_size = 50      # len(word2idx) + 1  (synthetic)
    embed_dim = 128      # multiple of 128 -> lane-dense vregs
    batch = 30           # not a multiple of the tile: exercises padding path

    key = jax.random.PRNGKey(0)
    k_w1, k_w2, k_i1, k_i2, k_lab = jax.random.split(key, 5)

    # Deterministic parameter init (the two embedding tables of the embed module).
    embed_in = jax.random.normal(k_w1, (vocab_size, embed_dim), jnp.float32) * 0.1
    embed_out = jax.random.normal(k_w2, (vocab_size, embed_dim), jnp.float32) * 0.1

    word1 = jax.random.randint(k_i1, (batch,), 0, vocab_size, dtype=jnp.int32)
    word2 = jax.random.randint(k_i2, (batch,), 0, vocab_size, dtype=jnp.int32)
    label = jax.random.randint(k_lab, (batch,), 0, 2, dtype=jnp.int32)  # 0/1

    loss = sgns_forward(embed_in, embed_out, word1, word2, label)
    jax.block_until_ready(loss)

    # Pure-JAX reference of the same forward semantics. The kernel stores the
    # tables in bf16 (exact row selection; only stored values are rounded), so
    # the reference uses the identically-rounded tables for a tight comparison.
    ein_r = embed_in.astype(jnp.bfloat16).astype(jnp.float32)
    eout_r = embed_out.astype(jnp.bfloat16).astype(jnp.float32)
    e1 = jnp.take(ein_r, word1, axis=0)
    e2 = jnp.take(eout_r, word2, axis=0)
    pred_ref = jnp.log(jax.nn.sigmoid(jnp.sum(e1 * e2, axis=-1, keepdims=True)))
    loss_ref = jnp.mean(-label.astype(jnp.float32).reshape(-1, 1) * pred_ref)
    assert jnp.allclose(loss, loss_ref, atol=1e-5, rtol=1e-4), (loss, loss_ref)

    print("KERNEL_OK")
</pallas_src>

<mosaic_0001>
module attributes {stable_mosaic.version = 11 : i64} {
  func.func @sgns_loss_kernel(%arg0: i32, %arg1: memref<32x4xi32, #tpu.memory_space<vmem>>, %arg2: memref<128x128xbf16, #tpu.memory_space<vmem>>, %arg3: memref<128x128xbf16, #tpu.memory_space<vmem>>, %arg4: memref<8x128xf32, #tpu.memory_space<vmem>>) attributes {dimension_semantics = [#tpu.dimension_semantics<parallel>], iteration_bounds = array<i64: 1>, scalar_prefetch = 0 : i64, scratch_operands = 0 : i64, tpu.core_type = #tpu.core_type<tc>, window_params = [{transform_indices = @transform_0, window_bounds = array<i64: 32, 4>}, {pipeline_mode = #tpu.pipeline_mode<synchronous>, transform_indices = @transform_1, window_bounds = array<i64: 128, 128>}, {pipeline_mode = #tpu.pipeline_mode<synchronous>, transform_indices = @transform_2, window_bounds = array<i64: 128, 128>}, {transform_indices = @transform_3, window_bounds = array<i64: 8, 128>}]} {
    %c0 = arith.constant 0 : index
    %c0_0 = arith.constant 0 : index
    %0 = vector.load %arg1[%c0, %c0_0] : memref<32x4xi32, #tpu.memory_space<vmem>>, vector<32x4xi32>
    %1 = vector.extract_strided_slice %0 {offsets = [0, 0], sizes = [32, 1], strides = [1, 1]} : vector<32x4xi32> to vector<32x1xi32>
    %2 = vector.extract_strided_slice %0 {offsets = [0, 1], sizes = [32, 1], strides = [1, 1]} : vector<32x4xi32> to vector<32x1xi32>
    %3 = vector.extract_strided_slice %0 {offsets = [0, 2], sizes = [32, 1], strides = [1, 1]} : vector<32x4xi32> to vector<32x1xi32>
    %4 = arith.sitofp %3 : vector<32x1xi32> to vector<32x1xf32>
    %5 = tpu.iota {dimensions = array<i32: 1>} : vector<32x128xi32>
    %6 = vector.broadcast %1 : vector<32x1xi32> to vector<32x128xi32>
    %7 = arith.cmpi eq, %5, %6 : vector<32x128xi32>
    %8 = arith.extui %7 : vector<32x128xi1> to vector<32x128xi32>
    %9 = arith.sitofp %8 : vector<32x128xi32> to vector<32x128xf32>
    %10 = arith.truncf %9 : vector<32x128xf32> to vector<32x128xbf16>
    %11 = vector.broadcast %2 : vector<32x1xi32> to vector<32x128xi32>
    %12 = arith.cmpi eq, %5, %11 : vector<32x128xi32>
    %13 = arith.extui %12 : vector<32x128xi1> to vector<32x128xi32>
    %14 = arith.sitofp %13 : vector<32x128xi32> to vector<32x128xf32>
    %15 = arith.truncf %14 : vector<32x128xf32> to vector<32x128xbf16>
    %c0_1 = arith.constant 0 : index
    %c0_2 = arith.constant 0 : index
    %16 = vector.load %arg2[%c0_1, %c0_2] : memref<128x128xbf16, #tpu.memory_space<vmem>>, vector<128x128xbf16>
    %cst = arith.constant dense<0.000000e+00> : vector<32x128xf32>
    %17 = tpu.matmul %10, %16, %cst {dimension_numbers = #tpu.dot_dimension_numbers<[1], [0], [0], [1], [0, 0, 1, 1], [], []>} : vector<32x128xbf16>, vector<128x128xbf16>, vector<32x128xf32> -> vector<32x128xf32>
    %c0_3 = arith.constant 0 : index
    %c0_4 = arith.constant 0 : index
    %18 = vector.load %arg3[%c0_3, %c0_4] : memref<128x128xbf16, #tpu.memory_space<vmem>>, vector<128x128xbf16>
    %cst_5 = arith.constant dense<0.000000e+00> : vector<32x128xf32>
    %19 = tpu.matmul %15, %18, %cst_5 {dimension_numbers = #tpu.dot_dimension_numbers<[1], [0], [0], [1], [0, 0, 1, 1], [], []>} : vector<32x128xbf16>, vector<128x128xbf16>, vector<32x128xf32> -> vector<32x128xf32>
    %20 = arith.mulf %17, %19 : vector<32x128xf32>
    %cst_6 = arith.constant dense<0.000000e+00> : vector<32xf32>
    %21 = vector.multi_reduction <add>, %20, %cst_6 [1] : vector<32x128xf32> to vector<32xf32>
    %22 = vector.shape_cast %21 : vector<32xf32> to vector<32x1xf32>
    %cst_7 = arith.constant 0.000000e+00 : f32
    %23 = vector.broadcast %cst_7 : f32 to vector<32x1xf32>
    %24 = arith.minimumf %22, %23 : vector<32x1xf32>
    %25 = math.absf %22 : vector<32x1xf32>
    %cst_8 = arith.constant 0.000000e+00 : f32
    %26 = vector.broadcast %cst_8 : f32 to vector<32x1xf32>
    %27 = arith.subf %26, %25 : vector<32x1xf32>
    %28 = math.exp %27 : vector<32x1xf32>
    %29 = math.log1p %28 : vector<32x1xf32>
    %30 = arith.subf %24, %29 : vector<32x1xf32>
    %cst_9 = arith.constant 0.000000e+00 : f32
    %31 = vector.broadcast %cst_9 : f32 to vector<32x1xf32>
    %32 = arith.subf %31, %4 : vector<32x1xf32>
    %33 = arith.mulf %32, %30 : vector<32x1xf32>
    %34 = vector.shape_cast %33 : vector<32x1xf32> to vector<1x32x1xf32>
    %cst_10 = arith.constant dense<0.000000e+00> : vector<1xf32>
    %35 = vector.multi_reduction <add>, %34, %cst_10 [1, 2] : vector<1x32x1xf32> to vector<1xf32>
    %36 = vector.shape_cast %35 : vector<1xf32> to vector<1x1x1xf32>
    %37 = vector.extract %36[0, 0, 0] : f32 from vector<1x1x1xf32>
    %38 = vector.broadcast %37 : f32 to vector<8x128xf32>
    %c0_11 = arith.constant 0 : index
    %c0_12 = arith.constant 0 : index
    %39 = vector.load %arg4[%c0_11, %c0_12] : memref<8x128xf32, #tpu.memory_space<vmem>>, vector<8x128xf32>
    tpu.vector_store %arg4[%c0_11, %c0_12], %38 {strides = array<i32>} : memref<8x128xf32, #tpu.memory_space<vmem>>, vector<8x128xf32>,
    return
  }
  func.func @transform_0(%arg0: i32) -> (i32, i32) {
    %c0_i32 = arith.constant 0 : i32
    %c0_i32_0 = arith.constant 0 : i32
    return %arg0, %c0_i32 : i32, i32
  }
  func.func @transform_1(%arg0: i32) -> (i32, i32) {
    %c0_i32 = arith.constant 0 : i32
    %c0_i32_0 = arith.constant 0 : i32
    %c0_i32_1 = arith.constant 0 : i32
    return %c0_i32, %c0_i32_0 : i32, i32
  }
  func.func @transform_2(%arg0: i32) -> (i32, i32) {
    %c0_i32 = arith.constant 0 : i32
    %c0_i32_0 = arith.constant 0 : i32
    %c0_i32_1 = arith.constant 0 : i32
    return %c0_i32, %c0_i32_0 : i32, i32
  }
  func.func @transform_3(%arg0: i32) -> (i32, i32) {
    %c0_i32 = arith.constant 0 : i32
    %c0_i32_0 = arith.constant 0 : i32
    return %arg0, %c0_i32 : i32, i32
  }
}

</mosaic_0001>

<bundles_post_ra>
// kernel: tpu_custom_call.1
= control target key start
LH: loop header
LB: loop body
LE: loop exit
PB: predicated region body
PF: predicated region fallthrough
CT: control target
= control target key end

     0   :  { %8 = vsyncpa [#allocation3], 0  ;;  %s784_s0 = inlined_call_operand.vmem [shape: s32[32,4], index: 0, kind: input, shape index: {}]   ;;  %s785_s1 = inlined_call_operand.hbm [shape: bf16[128,128], index: 1, kind: input, shape index: {}]   ;;  %s786_s2 = inlined_call_operand.hbm [shape: bf16[128,128], index: 2, kind: input, shape index: {}]   ;;  %s787_s3 = inlined_call_operand.hbm [shape: f32[8,128], index: 3, kind: output, shape index: {}]  }
   0x1   :  { %9 = vsyncpa [#allocation6], 0 }
   0x2   :  { %10 = vsyncpa [#allocation4], 0  ;;  %s675_s12 = smov [#allocation2]   ;;  %s603_s16 = scalar_lea.hbm %s785_s1, 1024 }
   0x3   :  { %s18_s13 = sshll.u32 %s675_s12, 4  ;;  %p604_p0 = scmp.ne.s32.totalorder %s785_s1, %s603_s16  ;;  %s19_s13 = int_to_ptr.vmem [resolvable:$true] %s18_s13 }
   0x4   :  { %p607_p1 = scmp.lt.u32.totalorder %s603_s16, %s785_s1 }
   0x6   :  { %p609_p2 = pnand %p607_p1, %p604_p0 }
   0x8   :  { %612 = shalt.err (!%p609_p2)
}
   0x9   :  { %s613_s21 = scalar_lea.vmem %s19_s13, 1024  ;;  %p618_p4 = scmp.lt.s32.totalorder %s19_s13, %s19_s13 }
   0xa   :  { %p614_p3 = scmp.ne.s32.totalorder %s19_s13, %s613_s21  ;;  %p619_p5 = scmp.lt.s32.totalorder %s613_s21, %s613_s21 }
   0xc   :  { %p620_p6 = por %p619_p5, %p618_p4 }
   0xe   :  { %p621_p7 = pnand %p620_p6, %p614_p3 }
  0x10   :  { %624 = shalt.err (!%p621_p7)
}
  0x11   :  { %s676_s22 = smov 64   ;;  %s677_s23 = smov 4  }
  0x12   :  { %24 = dma.hbm_to_vmem [thread:$0]  %s785_s1, 1024, %s19_s13, [#allocation3], %s676_s22, %s676_s22, %s677_s23  }
  0x13   :  { %s678_s26 = smov [#allocation5]   ;;  %s625_s30 = scalar_lea.hbm %s786_s2, 1024 }
  0x14   :  { %s30_s27 = sshll.u32 %s678_s26, 4  ;;  %p626_p8 = scmp.ne.s32.totalorder %s786_s2, %s625_s30  ;;  %s31_s27 = int_to_ptr.vmem [resolvable:$true] %s30_s27 }
  0x15   :  { %p629_p9 = scmp.lt.u32.totalorder %s625_s30, %s786_s2 }
  0x17   :  { %p631_p10 = pnand %p629_p9, %p626_p8 }
  0x19   :  { %634 = shalt.err (!%p631_p10)
}
  0x1a   :  { %s635_s8 = scalar_lea.vmem %s31_s27, 1024  ;;  %p640_p12 = scmp.lt.s32.totalorder %s31_s27, %s31_s27 }
  0x1b   :  { %p636_p11 = scmp.ne.s32.totalorder %s31_s27, %s635_s8  ;;  %p641_p13 = scmp.lt.s32.totalorder %s635_s8, %s635_s8 }
  0x1d   :  { %p642_p0 = por %p641_p13, %p640_p12 }
  0x1f   :  { %p643_p1 = pnand %p642_p0, %p636_p11 }
  0x21   :  { %646 = shalt.err (!%p643_p1)
}
  0x22   :  { %36 = dma.hbm_to_vmem [thread:$0]  %s786_s2, 1024, %s31_s27, [#allocation6], %s676_s22, %s676_s22, %s677_s23  }
  0x23   :  { %669 = dma.done.wait [#allocation3], 1024  }
  0x24   :  { %670 = vsyncadd [#allocation3], 4294966272 }
  0x25   :  { %671 = dma.done.wait [#allocation6], 1024  }
  0x26   :  { %672 = vsyncadd [#allocation6], 4294966272  ;;  %v679_v0 = vmov 1   ;;  %v680_v1 = vmov 0   ;;  %v731_v2 = vld [vmem:[%s784_s0] sm:$0xff]  ;;  %v738_v3 = vld [vmem:[%s784_s0 + $0x8] sm:$0xff]  ;;  %v52_v22 = vlaneseq }
  0x27   :  { %567 = vset.pattern.permute.xlu1 %v679_v0  ;;  %566 = vset.pattern.permute.xlu0 %v680_v1  ;;  %v571_v4 = vld [vmem:[#allocation2] sm:$0xff]   ;;  %v572_v5 = vld [vmem:[#allocation2 + $0x8] sm:$0xff]   ;;  %v743_v6 = vld [vmem:[%s784_s0 + $0x10] sm:$0xff]  ;;  %v681_v28 = vmov 1.0|1.0   ;;  %s683_s17 = smov [#allocation7]  }
  0x28   :  { %81 = vperm.xlu1 %567, %v731_v2   ;;  %55 = vperm.xlu0 %566, %v731_v2   ;;  %v573_v7 = vld [vmem:[#allocation5] sm:$0xff]   ;;  %v750_v8 = vld [vmem:[%s784_s0 + $0x18] sm:$0xff]  ;;  %v575_v9 = vld [vmem:[#allocation5 + $0x8] sm:$0xff]   ;;  %v53_v25 = vand.u32 127, %v52_v22  ;;  %s682_s0 = smov 126   ;;  %s453_s18 = sshll.u32 %s683_s17, 4  ;;  %s454_s18 = int_to_ptr.vmem [resolvable:$true] %s453_s18 }
  0x29   :  { %515 = vmatprep.subr.bf16.mxu0 %v571_v4  ;;  %535 = vmatprep.subr.bf16.mxu1 %v573_v7  ;;  %v574_v10 = vld [vmem:[#allocation2 + $0x10] sm:$0xff]   ;;  %v576_v12 = vld [vmem:[#allocation2 + $0x18] sm:$0xff]   ;;  %v578_v14 = vld [vmem:[#allocation2 + $0x20] sm:$0xff]   ;;  %s647_s20 = scalar_lea.vmem %s454_s18, 128  ;;  %p652_p3 = scmp.lt.s32.totalorder %s454_s18, %s454_s18 }
  0x2a   :  { %516 = vmatpush3.bf16.msra.mxu0 %v571_v4  ;;  %536 = vmatpush3.bf16.msra.mxu1 %v573_v7  ;;  %v577_v11 = vld [vmem:[#allocation5 + $0x10] sm:$0xff]   ;;  %v579_v13 = vld [vmem:[#allocation5 + $0x18] sm:$0xff]   ;;  %v581_v15 = vld [vmem:[#allocation5 + $0x20] sm:$0xff]   ;;  %p648_p2 = scmp.ne.s32.totalorder %s454_s18, %s647_s20  ;;  %p653_p4 = scmp.lt.s32.totalorder %s647_s20, %s647_s20 }
  0x2b   :  { %517 = vmatprep.subr.bf16.mxu0 %v572_v5  ;;  %537 = vmatprep.subr.bf16.mxu1 %v575_v9  ;;  %v580_v16 = vld [vmem:[#allocation2 + $0x28] sm:$0xff]   ;;  %v582_v18 = vld [vmem:[#allocation2 + $0x30] sm:$0xff]   ;;  %v584_v20 = vld [vmem:[#allocation2 + $0x38] sm:$0xff]  }
  0x2c   :  { %84 = vperm.xlu1 %567, %v738_v3   ;;  %58 = vperm.xlu0 %566, %v738_v3   ;;  %v583_v17 = vld [vmem:[#allocation5 + $0x28] sm:$0xff]   ;;  %v585_v19 = vld [vmem:[#allocation5 + $0x30] sm:$0xff]   ;;  %v586_v21 = vld [vmem:[#allocation5 + $0x38] sm:$0xff]   ;;  %p654_p5 = por %p653_p4, %p652_p3 }
  0x2e   :  { %518 = vmatpush3.bf16.msra.mxu0 %v572_v5  ;;  %538 = vmatpush3.bf16.msra.mxu1 %v575_v9  ;;  %p655_p6 = pnand %p654_p5, %p648_p2 }
  0x2f   :  { %519 = vmatprep.subr.bf16.mxu0 %v574_v10  ;;  %539 = vmatprep.subr.bf16.mxu1 %v577_v11 }
  0x30   :  { %568 = vset.pattern.permute.xlu1 %v680_v1  ;;  %61 = vperm.xlu0 %566, %v743_v6  }
  0x31   :  { %64 = vperm.xlu1 %568, %v750_v8  }
  0x32   :  { %520 = vmatpush3.bf16.msra.mxu0 %v574_v10  ;;  %540 = vmatpush3.bf16.msra.mxu1 %v577_v11  ;;  %v48_v11 = vcvt.s32.f32 %v731_v2 }
  0x33   :  { %521 = vmatprep.subr.bf16.mxu0 %v576_v12  ;;  %541 = vmatprep.subr.bf16.mxu1 %v579_v13 }
  0x34   :  { %569 = vset.pattern.permute.xlu0 %v679_v0  ;;  %v404_v22 = vsub.f32 0.0, %v48_v11 }
  0x35   :  { %570 = vset.pattern.permute.xlu1 %v679_v0  ;;  %87 = vperm.xlu0 %569, %v743_v6  }
  0x36   :  { %90 = vperm.xlu1 %570, %v750_v8   ;;  %522 = vmatpush3.bf16.msra.mxu0 %v576_v12 }
  0x37   :  { %523 = vmatprep.subr.bf16.mxu0 %v578_v14  ;;  %542 = vmatpush3.bf16.msra.mxu1 %v579_v13 }
  0x38   :  { %543 = vmatprep.subr.bf16.mxu1 %v581_v15 }
  0x3a   :  { %524 = vmatpush3.bf16.msra.mxu0 %v578_v14  ;;  %v49_v14 = vcvt.s32.f32 %v738_v3 }
  0x3b   :  { %525 = vmatprep.subr.bf16.mxu0 %v580_v16  ;;  %544 = vmatpush3.bf16.msra.mxu1 %v581_v15 }
  0x3c   :  { %545 = vmatprep.subr.bf16.mxu1 %v583_v17  ;;  %v405_v2 = vsub.f32 0.0, %v49_v14 }
  0x3e   :  { %526 = vmatpush3.bf16.msra.mxu0 %v580_v16  ;;  %v51_v16 = vcvt.s32.f32 %v750_v8 }
  0x3f   :  { %527 = vmatprep.subr.bf16.mxu0 %v582_v18  ;;  %546 = vmatpush3.bf16.msra.mxu1 %v583_v17 }
  0x40   :  { %547 = vmatprep.subr.bf16.mxu1 %v585_v19 }
  0x42   :  { %528 = vmatpush3.bf16.msra.mxu0 %v582_v18 }
  0x43   :  { %529 = vmatprep.subr.bf16.mxu0 %v584_v20  ;;  %548 = vmatpush3.bf16.msra.mxu1 %v585_v19  ;;  %v50_v19 = vcvt.s32.f32 %v743_v6 }
  0x44   :  { %549 = vmatprep.subr.bf16.mxu1 %v586_v21 }
  0x46   :  { %530 = vmatpush3.bf16.msra.mxu0 %v584_v20 }
  0x47   :  { %550 = vmatpush3.bf16.msra.mxu1 %v586_v21 }
  0xa7   :  { %v82_v23 = vpop.permute.xlu1 %81  ;;  %v56_v24 = vpop.permute.xlu0 %55 }
  0xa8   :  { %vm66_vm0 = vcmp.eq.s32.totalorder %v53_v25, %v56_v24  ;;  %vm92_vm3 = vcmp.eq.s32.totalorder %v53_v25, %v82_v23 }
  0xab   :  { %v85_v26 = vpop.permute.xlu1 %84  ;;  %v59_v27 = vpop.permute.xlu0 %58 }
  0xac   :  { %vm93_vm1 = vcmp.eq.s32.totalorder %v53_v25, %v85_v26  ;;  %vm67_vm2 = vcmp.eq.s32.totalorder %v53_v25, %v59_v27 }
  0xad   :  { %vm479_vm4 = vmpackc.low %vm67_vm2, %vm66_vm0  ;;  %vm428_vm0 = vcmask 7168  }
  0xae   :  { %531 = vmatprep.mubr.msk.bf16.mxu0 %vm479_vm4, %v681_v28  ;;  %vm491_vm5 = vmpackc.low %vm93_vm1, %vm92_vm3 }
  0xaf   :  { %551 = vmatprep.mubr.msk.bf16.mxu1 %vm491_vm5, %v681_v28  ;;  %v62_v29 = vpop.permute.xlu0 %61 }
  0xb0   :  { %vm68_vm6 = vcmp.eq.s32.totalorder %v53_v25, %v62_v29  ;;  %v65_v30 = vpop.permute.xlu1 %64  ;;  %v407_v29 = vsub.f32 0.0, %v51_v16 }
  0xb1   :  { %vm69_vm7 = vcmp.eq.s32.totalorder %v53_v25, %v65_v30 }
  0xb2   :  { %vm481_vm8 = vmpackc.low %vm69_vm7, %vm68_vm6 }
  0xb3   :  { %532 = vmatmul.mubr.msk.bf16.vlgmr.msra.gmra.mrb[0].mxu0 %vm481_vm8, %v681_v28 }
  0xb4   :  { %v88_v31 = vpop.permute.xlu0 %87 }
  0xb5   :  { %v91_v32 = vpop.permute.xlu1 %90  ;;  %vm94_vm9 = vcmp.eq.s32.totalorder %v53_v25, %v88_v31 }
  0xb6   :  { %vm95_vm10 = vcmp.eq.s32.totalorder %v53_v25, %v91_v32 }
  0xb7   :  { %vm493_vm11 = vmpackc.low %vm95_vm10, %vm94_vm9 }
  0xb8   :  { %552 = vmatmul.mubr.msk.bf16.vlgmr.msra.gmra.mrb[0].mxu1 %vm493_vm11, %v681_v28 }
 0x186   :  { %v533_v33 = vpop.f32.mrb[0].mxu0 }
 0x187   :  { %v204_v34 = vpop.f32.mrb[1].mxu0 }
 0x188   :  { %v534_v35 = vpop.f32.mrb[2].mxu0 }
 0x189   :  { %v207_v36 = vpop.f32.mrb[3].mxu0 }
 0x18b   :  { %v553_v37 = vpop.f32.mrb[0].mxu1 }
 0x18c   :  { %v334_v38 = vmul.f32 %v553_v37, %v533_v33  ;;  %v317_v39 = vpop.f32.mrb[1].mxu1 }
 0x18d   :  { %v332_v40 = vmul.f32 %v317_v39, %v204_v34  ;;  %v554_v41 = vpop.f32.mrb[2].mxu1 }
 0x18e   :  { %v335_v42 = vmul.f32 %v554_v41, %v534_v35  ;;  %v320_v43 = vpop.f32.mrb[3].mxu1 }
 0x18f   :  { %v333_v44 = vmul.f32 %v320_v43, %v207_v36  ;;  %336 = vadd.xlane.f32.xlu1 %v332_v40 }
 0x191   :  { %338 = vadd.xlane.f32.xlu0 %v333_v44 }
 0x193   :  { %342 = vadd.xlane.f32.xlu1 %v335_v42 }
 0x195   :  { %340 = vadd.xlane.f32.xlu0 %v334_v38 }
 0x21c   :  { %v337_v45 = vpop.xlane.xlu1 %336 }
 0x21d   :  { %v348_v46 = vand.u32 2147483647, %v337_v45  ;;  %v344_v27 = vmin.f32 %v337_v45, 0.0 }
 0x21e   :  { %v756_v47 = vpop.xlane.xlu0 %338 }
 0x21f   :  { %v352_v48 = vsub.f32 0.0, %v348_v46  ;;  %v349_v49 = vand.u32 2147483647, %v756_v47  ;;  %v345_v33 = vmin.f32 %v756_v47, 0.0  ;;  %v406_v47 = vsub.f32 0.0, %v50_v19 }
 0x220   :  { %v759_v50 = vpop.xlane.xlu1 %342 }
 0x221   :  { %v356_v51 = vmul.f32 1.442695, %v352_v48  ;;  %v353_v52 = vsub.f32 0.0, %v349_v49  ;;  %v351_v53 = vand.u32 2147483647, %v759_v50  ;;  %v347_v39 = vmin.f32 %v759_v50, 0.0 }
 0x222   :  { %v762_v54 = vpop.xlane.xlu0 %340 }
 0x223   :  { %587 = vpow2.f32 %v356_v51  ;;  %v358_v55 = vmul.f32 1.442695, %v353_v52  ;;  %v355_v56 = vsub.f32 0.0, %v351_v53  ;;  %v350_v57 = vand.u32 2147483647, %v762_v54 }
 0x224   :  { %v346_v48 = vmin.f32 %v762_v54, 0.0 }
 0x225   :  { %589 = vpow2.f32 %v358_v55  ;;  %v362_v58 = vmul.f32 1.442695, %v355_v56  ;;  %v354_v59 = vsub.f32 0.0, %v350_v57 }
 0x227   :  { %591 = vpow2.f32 %v362_v58  ;;  %v360_v60 = vmul.f32 1.442695, %v354_v59 }
 0x229   :  { %593 = vpow2.f32 %v360_v60 }
 0x22d   :  { %v588_v61 = vpop.eup %587 }
 0x22e   :  { %v364_v62 = vadd.f32 1.0, %v588_v61  ;;  %v367_v5 = vmul.f32 -0.5, %v588_v61  ;;  %v370_v15 = vand.u32 2147483647, %v588_v61 }
 0x22f   :  { %v590_v63 = vpop.eup %589 }
 0x230   :  { %595 = vlog2.f32 %v364_v62  ;;  %v373_v0 = vadd.f32 1.0, %v590_v63  ;;  %v376_v9 = vmul.f32 -0.5, %v590_v63  ;;  %v368_v12 = vadd.f32 1.0, %v367_v5 }
 0x231   :  { %v592_v1 = vpop.eup %591  ;;  %v379_v20 = vand.u32 2147483647, %v590_v63  ;;  %vm371_vm12 = vcmp.lt.f32.partialorder %v370_v15, 0.0004427343 }
 0x232   :  { %597 = vlog2.f32 %v373_v0  ;;  %v391_v4 = vadd.f32 1.0, %v592_v1  ;;  %v394_v13 = vmul.f32 -0.5, %v592_v1  ;;  %v377_v17 = vadd.f32 1.0, %v376_v9 }
 0x233   :  { %v594_v7 = vpop.eup %593  ;;  %v369_v24 = vmul.f32 %v588_v61, %v368_v12  ;;  %v397_v28 = vand.u32 2147483647, %v592_v1  ;;  %vm380_vm13 = vcmp.lt.f32.partialorder %v379_v20, 0.0004427343 }
 0x234   :  { %599 = vlog2.f32 %v391_v4  ;;  %v382_v10 = vadd.f32 1.0, %v594_v7  ;;  %v385_v21 = vmul.f32 -0.5, %v594_v7  ;;  %v395_v25 = vadd.f32 1.0, %v394_v13 }
 0x235   :  { %v378_v31 = vmul.f32 %v590_v63, %v377_v17  ;;  %v388_v37 = vand.u32 2147483647, %v594_v7  ;;  %vm398_vm14 = vcmp.lt.f32.partialorder %v397_v28, 0.0004427343 }
 0x236   :  { %601 = vlog2.f32 %v382_v10  ;;  %v386_v6 = vadd.f32 1.0, %v385_v21  ;;  %v396_v36 = vmul.f32 %v592_v1, %v395_v25 }
 0x237   :  { %vm389_vm15 = vcmp.lt.f32.partialorder %v388_v37, 0.0004427343 }
 0x238   :  { %v387_v45 = vmul.f32 %v594_v7, %v386_v6 }
 0x23a   :  { %v596_v18 = vpop.eup %595 }
 0x23b   :  { %v366_v23 = vmul.f32 0.6931472, %v596_v18 }
 0x23c   :  { %v598_v26 = vpop.eup %597 }
 0x23d   :  { %v372_v3 = vsel %vm371_vm12, %v369_v24, %v366_v23  ;;  %v375_v30 = vmul.f32 0.6931472, %v598_v26 }
 0x23e   :  { %v600_v8 = vpop.eup %599  ;;  %v400_v32 = vsub.f32 %v344_v27, %v372_v3 }
 0x23f   :  { %v381_v34 = vsel %vm380_vm13, %v378_v31, %v375_v30  ;;  %v393_v35 = vmul.f32 0.6931472, %v600_v8 }
 0x240   :  { %v401_v38 = vsub.f32 %v345_v33, %v381_v34  ;;  %v408_v40 = vmul.f32 %v404_v22, %v400_v32  ;;  %v602_v41 = vpop.eup %601 }
 0x241   :  { %v399_v42 = vsel %vm398_vm14, %v396_v36, %v393_v35  ;;  %v384_v44 = vmul.f32 0.6931472, %v602_v41 }
 0x242   :  { %v403_v43 = vsub.f32 %v347_v39, %v399_v42  ;;  %416 = vrot.lane.b32.xlu0 %v408_v40, %s682_s0  ;;  %v409_v46 = vmul.f32 %v405_v2, %v401_v38 }
 0x243   :  { %v390_v49 = vsel %vm389_vm15, %v387_v45, %v384_v44 }
 0x244   :  { %418 = vrot.lane.b32.xlu1 %v409_v46, %s682_s0  ;;  %v411_v51 = vmul.f32 %v407_v29, %v403_v43  ;;  %v402_v52 = vsub.f32 %v346_v48, %v390_v49 }
 0x246   :  { %422 = vrot.lane.b32.xlu0 %v411_v51, %s682_s0  ;;  %v410_v50 = vmul.f32 %v406_v47, %v402_v52 }
 0x248   :  { %420 = vrot.lane.b32.xlu1 %v410_v50, %s682_s0 }
 0x2b4   :  { %v417_v53 = vpop.permute.xlu0 %416 }
 0x2b5   :  { %v429_v57 = vsel %vm428_vm0, %v417_v53, 0.0 }
 0x2b6   :  { %v419_v55 = vpop.permute.xlu1 %418 }
 0x2b7   :  { %v430_v56 = vsel %vm428_vm0, %v419_v55, 0.0 }
 0x2b8   :  { %v431_v58 = vadd.f32 %v430_v56, %v429_v57  ;;  %v423_v59 = vpop.permute.xlu0 %422 }
 0x2b9   :  { %v434_v63 = vsel %vm428_vm0, %v423_v59, 0.0 }
 0x2ba   :  { %v421_v60 = vpop.permute.xlu1 %420 }
 0x2bb   :  { %v432_v61 = vsel %vm428_vm0, %v421_v60, 0.0 }
 0x2bc   :  { %v433_v62 = vadd.f32 %v432_v61, %v431_v58 }
 0x2be   :  { %v435_v54 = vadd.f32 %v434_v63, %v433_v62 }
 0x2c0   :  { %436 = vadd.xlane.f32.xlu1 %v435_v54 }
 0x34d   :  { %v437_v0 = vpop.xlane.xlu1 %436 }
 0x34e   :  { %v438_v1 = vrot.slane %v437_v0, 4 }
 0x350   :  { %v439_v4 = vadd.f32 %v438_v1, %v437_v0 }
 0x352   :  { %v440_v5 = vrot.slane %v439_v4, 2 }
 0x354   :  { %v441_v7 = vadd.f32 %v440_v5, %v439_v4 }
 0x356   :  { %v442_v9 = vrot.slane %v441_v7, 1 }
 0x358   :  { %v443_v10 = vadd.f32 %v442_v9, %v441_v7 }
 0x35a   :  { %555 = vpush %v443_v10 }
 0x38b   :  { %s556_s19 = spop %555 }
 0x38c   :  { %v445_v11 = vstv %s556_s19 }
 0x38d   :  { %446 = vst [vmem:[#allocation7] sm:$0xff] %v445_v11 }
 0x38e   :  { %658 = shalt.err (!%p655_p6)
}
 0x38f   :  { %s659_s23 = scalar_lea.hbm %s787_s3, 128 }
 0x390   :  { %p660_p7 = scmp.ne.s32.totalorder %s787_s3, %s659_s23  ;;  %p663_p8 = scmp.lt.u32.totalorder %s659_s23, %s787_s3 }
 0x392   :  { %p665_p9 = pnand %p663_p8, %p660_p7 }
 0x394   :  { %668 = shalt.err (!%p665_p9)
}
 0x395   :  { %456 = dma.vmem_to_hbm [thread:$0]  %s454_s18, 128, %s787_s3, [#allocation4]  }
 0x396   :  { %673 = dma.done.wait [#allocation4], 128  }
 0x397   :  { %674 = vsyncadd [#allocation4], 4294967168 }
 0x398   :  { %460 = vsyncpa [#allocation3], 1 }
 0x399   :  { %461 = vsyncpa [#allocation6], 1 }
 0x39a   :  { %462 = vsyncpa [#allocation4], 1 }

</bundles_post_ra>
